<compile_context>
chip_gen: v5e
topology: v5e:2x2
jax: 0.10.0
libtpu: 0.0.40
codegen_flags: <defaults>
</compile_context>

<pallas_src>
import functools

import numpy as np
import jax
import jax.numpy as jnp
from jax import lax
from jax.experimental import pallas as pl
from jax.experimental.pallas import tpu as pltpu


def _block_out_kernel(x_ref, slab_ref, o_ref, *, H, W, K, Cmid):
    # x_ref   : (B, Cin, H*W)  input tile (lane axis = H*W)
    # slab_ref: (Crow, P)      packed params [w1 | b1 | dw | dwb | w2 | b2]
    # o_ref   : (B, Cout, H*W) output tile
    B, Cin, HW = x_ref.shape
    Cout = o_ref.shape[1]
    KK = K * K
    P = K // 2

    # --- unpack the parameter slab (once per grid step) ---------------------
    slab = slab_ref[...]
    off = 0
    w1 = slab[:Cmid, off:off + Cin]; off += Cin        # (Cmid, Cin), BN folded
    b1 = slab[:Cmid, off:off + 1]; off += 1            # (Cmid, 1)
    dw = slab[:Cmid, off:off + KK]; off += KK          # (Cmid, K*K)
    dwb = slab[:Cmid, off:off + 1]; off += 1           # (Cmid, 1)
    w2 = slab[:, off:off + Cmid]; off += Cmid          # (Crow, Cmid); rows >= Cout are 0
    b2 = slab[:, off:off + 1]                          # (Crow, 1);    rows >= Cout are 0
    Crow = slab.shape[0]

    # --- loop-invariant broadcasts (JAX does not CSE broadcast_in_dim) ------
    b1_full = jnp.broadcast_to(b1, (Cmid, HW))
    dwb_full = jnp.broadcast_to(dwb, (Cmid, HW))
    b2_full = jnp.broadcast_to(b2, (Crow, HW))

    # --- depthwise taps: fold zero-pad border masks into per-tap weight planes
    # (a zero weight annihilates the wrapped-around values the mask guarded).
    # NOTE: masks assume the lane axis spans exactly ONE image (HW); if the lane
    # axis were ever batch-flattened the vertical terms must use lane % HW.
    lane = lax.broadcasted_iota(jnp.int32, (1, HW), 1)
    col = lane % W
    tap_planes = []
    for dy in range(K):
        oy = dy - P
        for dx in range(K):
            ox = dx - P
            t = dy * K + dx
            off_t = oy * W + ox
            valid = None
            if ox < 0:
                valid = col >= (-ox)
            elif ox > 0:
                valid = col < (W - ox)
            if oy < 0:
                vy = lane >= (-oy) * W
                valid = vy if valid is None else jnp.logical_and(valid, vy)
            elif oy > 0:
                vy = lane < (H - oy) * W
                valid = vy if valid is None else jnp.logical_and(valid, vy)
            w_col = dw[:, t:t + 1]                                   # (Cmid, 1)
            if valid is None:
                plane = jnp.broadcast_to(w_col, (Cmid, HW))
            else:
                plane = w_col * valid.astype(jnp.float32)            # (Cmid, HW)
            tap_planes.append((off_t, plane))

    # --- per-image body, iterated with a bounded-live-range fori_loop -------
    def body(b, carry):
        xb = x_ref[b].astype(jnp.float32)                            # (Cin, HW)

        # convPW1 (+ folded eval-mode BN) + ReLU  — MXU
        h = jnp.dot(w1, xb, preferred_element_type=jnp.float32) + b1_full
        h = jnp.maximum(h, 0.0)                                      # (Cmid, HW)

        # convDW: depthwise KxK, stride 1, 'same' pad — lane rolls + FMAs
        acc = dwb_full
        for off_t, plane in tap_planes:
            shifted = h if off_t == 0 else pltpu.roll(h, (-off_t) % HW, axis=1)
            acc = acc + plane * shifted
        acc = jnp.where(acc > 0, acc, 0.2 * acc)                     # LeakyReLU(0.2)

        # convPW2 + Tanh — MXU (padded rows of w2/b2 are zero)
        out = jnp.dot(w2, acc, preferred_element_type=jnp.float32) + b2_full
        o_ref[b] = jnp.tanh(out[:Cout]).astype(o_ref.dtype)
        return carry

    lax.fori_loop(0, B, body, None, unroll=min(4, B))


def block_out_forward(x_nchw, params, *, batch_tile=128):
    w1t, b1, bns, bnb, dww, dwb, w2t, b2 = params
    N, Cin, H, W = x_nchw.shape
    Cmid = w1t.shape[1]
    Cout = w2t.shape[1]
    K = dww.shape[0]
    KK = K * K
    HW = H * W

    # Fold eval-mode BN into PW1 weights/bias.
    # TODO(synk): BatchNorm is eval-mode only (running stats folded into PW1);
    # training-mode batch statistics are not computed in-kernel.
    scale = bns.reshape(Cmid).astype(jnp.float32)
    shift = bnb.reshape(Cmid).astype(jnp.float32)
    w1k = (w1t.astype(jnp.float32) * scale[None, :]).T             # (Cmid, Cin)
    b1k = (b1.reshape(Cmid) * scale + shift).reshape(Cmid, 1)      # (Cmid, 1)
    dwk = dww.reshape(KK, Cmid).T.astype(jnp.float32)              # (Cmid, K*K)
    dwbk = dwb.reshape(Cmid, 1).astype(jnp.float32)                # (Cmid, 1)
    w2k = w2t.T.astype(jnp.float32)                                # (Cout, Cmid)
    b2k = b2.reshape(Cout, 1).astype(jnp.float32)                  # (Cout, 1)

    # Pack all params into one small slab -> one DMA / one padded VMEM tile.
    Crow = max(Cmid, Cout)

    def rpad(a):
        return jnp.pad(a, ((0, Crow - a.shape[0]), (0, 0)))

    slab = jnp.concatenate(
        [rpad(w1k), rpad(b1k), rpad(dwk), rpad(dwbk), rpad(w2k), rpad(b2k)],
        axis=1)                                                    # (Crow, Cin+3+KK+Cmid)

    # Free reshape: NCHW is contiguous over (H, W) -> lane axis = H*W.
    x = x_nchw.reshape(N, Cin, HW)

    # Batch tile: big enough to amortize per-grid-step overhead, clamped so
    # double-buffered in+out stays well inside v5e's 16 MiB scoped VMEM, and
    # adjusted so the grid has >= 2 steps whenever N > 1 (v7x has 2 TCs).
    bytes_per_img = (Cin + Cout) * HW * 4
    max_bt_vmem = max(1, (8 << 20) // (2 * bytes_per_img))
    B_TILE = max(1, min(batch_tile, N, max_bt_vmem))
    if N > 1 and pl.cdiv(N, B_TILE) < 2:
        B_TILE = pl.cdiv(N, 2)

    n_pad = (-N) % B_TILE
    if n_pad:
        x = jnp.pad(x, ((0, n_pad), (0, 0), (0, 0)))
    Np = x.shape[0]

    kernel = functools.partial(_block_out_kernel, H=H, W=W, K=K, Cmid=Cmid)

    # Explicit scoped-VMEM limit: covers double-buffered I/O + params + temps,
    # never below the smallest per-generation default (cheap v5e insurance).
    vmem_limit = int(min(32 << 20,
                         max(16 << 20, 4 * B_TILE * bytes_per_img + (4 << 20))))

    out = pl.pallas_call(
        kernel,
        out_shape=jax.ShapeDtypeStruct((Np, Cout, HW), jnp.float32),
        grid=(Np // B_TILE,),
        in_specs=[
            pl.BlockSpec((B_TILE, Cin, HW), lambda n: (n, 0, 0)),
            pl.BlockSpec(slab.shape, lambda n: (0, 0)),
        ],
        out_specs=pl.BlockSpec((B_TILE, Cout, HW), lambda n: (n, 0, 0)),
        compiler_params=pltpu.CompilerParams(
            dimension_semantics=("parallel",),
            vmem_limit_bytes=vmem_limit),
    )(x, slab)

    return out[:N].reshape(N, Cout, H, W)


def block_out_reference(x_nchw, params):
    """Pure-JAX reference of the same forward pass (for correctness check)."""
    w1t, b1, bns, bnb, dww, dwb, w2t, b2 = params
    hp = jax.lax.Precision.HIGHEST
    x = jnp.transpose(x_nchw, (0, 2, 3, 1)).astype(jnp.float32)
    N, H, W, Cin = x.shape
    K = dww.shape[0]
    P = K // 2
    h = jnp.einsum('nhwc,cd->nhwd', x, w1t, precision=hp) + b1[0]
    h = h * bns[0] + bnb[0]
    h = jnp.maximum(h, 0.0)
    hpad = jnp.pad(h, ((0, 0), (P, P), (P, P), (0, 0)))
    acc = jnp.zeros_like(h)
    for dy in range(K):
        for dx in range(K):
            acc = acc + hpad[:, dy:dy + H, dx:dx + W, :] * dww[dy, dx]
    acc = acc + dwb[0, 0]
    acc = jnp.where(acc > 0, acc, 0.2 * acc)
    o = jnp.einsum('nhwc,cd->nhwd', acc, w2t, precision=hp) + b2[0]
    o = jnp.tanh(o)
    return jnp.transpose(o, (0, 3, 1, 2))


if __name__ == "__main__":
    # Small config consistent with BlockOut:
    #   cfg = [[Cin, Cmid], Cmid, [Cmid, Cmid], [Cmid, Cout]], kernel=3
    #   => convDW has groups = min(Cmid, Cmid) = Cmid (pure depthwise).
    N, Cin, H, W = 2, 4, 16, 16
    expansion = 2
    Cmid = Cin * expansion      # 8
    Cout = 4
    K = 3

    key = jax.random.PRNGKey(0)
    ks = jax.random.split(key, 12)

    x = jax.random.normal(ks[0], (N, Cin, H, W), jnp.float32)

    # convPW1 weights (stored transposed: (Cin, Cmid) for x @ W)
    w1t = 0.4 * jax.random.normal(ks[1], (Cin, Cmid), jnp.float32)
    b1 = 0.1 * jax.random.normal(ks[2], (1, Cmid), jnp.float32)

    # BatchNorm2d(Cmid) eval-mode params folded into per-channel scale/shift
    gamma = 1.0 + 0.1 * jax.random.normal(ks[3], (Cmid,), jnp.float32)
    beta = 0.1 * jax.random.normal(ks[4], (Cmid,), jnp.float32)
    running_mean = 0.05 * jax.random.normal(ks[5], (Cmid,), jnp.float32)
    running_var = 1.0 + 0.1 * jnp.abs(jax.random.normal(ks[6], (Cmid,), jnp.float32))
    eps = 1e-5
    scale = gamma / jnp.sqrt(running_var + eps)
    shift = beta - running_mean * scale
    bns = scale.reshape(1, Cmid)
    bnb = shift.reshape(1, Cmid)

    # depthwise conv weights (K, K, Cmid) == torch (Cmid, 1, K, K) permuted
    dww = 0.3 * jax.random.normal(ks[7], (K, K, Cmid), jnp.float32)
    dwb = 0.1 * jax.random.normal(ks[8], (1, 1, Cmid), jnp.float32)

    # convPW2 weights (transposed: (Cmid, Cout))
    w2t = 0.4 * jax.random.normal(ks[9], (Cmid, Cout), jnp.float32)
    b2 = 0.1 * jax.random.normal(ks[10], (1, Cout), jnp.float32)

    params = (w1t, b1, bns, bnb, dww, dwb, w2t, b2)

    # Case 1: the module's nominal small batch (grid of 2 single-image steps).
    out = jax.block_until_ready(block_out_forward(x, params))
    ref = block_out_reference(x, params)
    err = float(jnp.max(jnp.abs(out - ref)))
    assert out.shape == (N, Cout, H, W), out.shape
    assert np.isfinite(np.asarray(out)).all()
    assert err < 1e-4, f"mismatch vs reference (N=2): max abs err = {err}"

    # Case 2: larger batch exercises the in-kernel fori_loop over several
    # images per grid step (B_TILE > 1, unrolled).
    N2 = 16
    x2 = jax.random.normal(ks[11], (N2, Cin, H, W), jnp.float32)
    out2 = jax.block_until_ready(block_out_forward(x2, params))
    ref2 = block_out_reference(x2, params)
    err2 = float(jnp.max(jnp.abs(out2 - ref2)))
    assert out2.shape == (N2, Cout, H, W), out2.shape
    assert np.isfinite(np.asarray(out2)).all()
    assert err2 < 1e-4, f"mismatch vs reference (N=16): max abs err = {err2}"

    print("KERNEL_OK")
</pallas_src>

<mosaic_0001>
module attributes {stable_mosaic.version = 11 : i64} {
  func.func @_block_out_kernel(%arg0: i32, %arg1: memref<1x4x256xf32, #tpu.memory_space<vmem>>, %arg2: memref<8x24xf32, #tpu.memory_space<vmem>>, %arg3: memref<1x4x256xf32, #tpu.memory_space<vmem>>) attributes {dimension_semantics = [#tpu.dimension_semantics<parallel>], iteration_bounds = array<i64: 2>, scalar_prefetch = 0 : i64, scratch_operands = 0 : i64, tpu.core_type = #tpu.core_type<tc>, window_params = [{transform_indices = @transform_0, window_bounds = array<i64: 1, 4, 256>}, {pipeline_mode = #tpu.pipeline_mode<synchronous>, transform_indices = @transform_1, window_bounds = array<i64: 8, 24>}, {transform_indices = @transform_2, window_bounds = array<i64: 1, 4, 256>}]} {
    %c0 = arith.constant 0 : index
    %c0_0 = arith.constant 0 : index
    %0 = vector.load %arg2[%c0, %c0_0] : memref<8x24xf32, #tpu.memory_space<vmem>>, vector<8x24xf32>
    %1 = vector.extract_strided_slice %0 {offsets = [0, 0], sizes = [8, 4], strides = [1, 1]} : vector<8x24xf32> to vector<8x4xf32>
    %2 = vector.extract_strided_slice %0 {offsets = [0, 4], sizes = [8, 1], strides = [1, 1]} : vector<8x24xf32> to vector<8x1xf32>
    %3 = vector.extract_strided_slice %0 {offsets = [0, 5], sizes = [8, 9], strides = [1, 1]} : vector<8x24xf32> to vector<8x9xf32>
    %4 = vector.extract_strided_slice %0 {offsets = [0, 14], sizes = [8, 1], strides = [1, 1]} : vector<8x24xf32> to vector<8x1xf32>
    %5 = vector.extract_strided_slice %0 {offsets = [0, 15], sizes = [8, 8], strides = [1, 1]} : vector<8x24xf32> to vector<8x8xf32>
    %6 = vector.extract_strided_slice %0 {offsets = [0, 23], sizes = [8, 1], strides = [1, 1]} : vector<8x24xf32> to vector<8x1xf32>
    %7 = vector.shape_cast %2 : vector<8x1xf32> to vector<8x1xf32>
    %8 = vector.broadcast %7 : vector<8x1xf32> to vector<8x256xf32>
    %9 = vector.shape_cast %4 : vector<8x1xf32> to vector<8x1xf32>
    %10 = vector.broadcast %9 : vector<8x1xf32> to vector<8x256xf32>
    %11 = vector.shape_cast %6 : vector<8x1xf32> to vector<8x1xf32>
    %12 = vector.broadcast %11 : vector<8x1xf32> to vector<8x256xf32>
    %13 = tpu.iota {dimensions = array<i32: 1>} : vector<1x256xi32>
    %c16_i32 = arith.constant 16 : i32
    %c0_i32 = arith.constant 0 : i32
    %14 = arith.cmpi eq, %c16_i32, %c0_i32 : i32
    %c1_i32 = arith.constant 1 : i32
    %15 = arith.select %14, %c1_i32, %c16_i32 : i32
    %16 = vector.broadcast %15 : i32 to vector<1x256xi32>
    %17 = arith.remsi %13, %16 : vector<1x256xi32>
    %c0_i32_1 = arith.constant 0 : i32
    %18 = vector.broadcast %c0_i32_1 : i32 to vector<1x256xi32>
    %19 = arith.cmpi ne, %17, %18 : vector<1x256xi32>
    %c0_i32_2 = arith.constant 0 : i32
    %20 = vector.broadcast %c0_i32_2 : i32 to vector<1x256xi32>
    %21 = arith.cmpi slt, %17, %20 : vector<1x256xi32>
    %c0_i32_3 = arith.constant 0 : i32
    %22 = arith.cmpi slt, %15, %c0_i32_3 : i32
    %23 = vector.broadcast %22 : i1 to vector<1x256xi1>
    %24 = vector.broadcast %23 : vector<1x256xi1> to vector<1x256xi1>
    %25 = arith.xori %21, %24 : vector<1x256xi1>
    %26 = arith.andi %25, %19 : vector<1x256xi1>
    %27 = vector.broadcast %15 : i32 to vector<1x256xi32>
    %28 = arith.addi %17, %27 : vector<1x256xi32>
    %29 = arith.select %26, %28, %17 : vector<1x256xi1>, vector<1x256xi32>
    %c1_i32_4 = arith.constant 1 : i32
    %30 = vector.broadcast %c1_i32_4 : i32 to vector<1x256xi32>
    %31 = arith.cmpi sge, %29, %30 : vector<1x256xi32>
    %c16_i32_5 = arith.constant 16 : i32
    %32 = vector.broadcast %c16_i32_5 : i32 to vector<1x256xi32>
    %33 = arith.cmpi sge, %13, %32 : vector<1x256xi32>
    %34 = arith.andi %31, %33 : vector<1x256xi1>
    %35 = vector.extract_strided_slice %3 {offsets = [0, 0], sizes = [8, 1], strides = [1, 1]} : vector<8x9xf32> to vector<8x1xf32>
    %36 = arith.extui %34 : vector<1x256xi1> to vector<1x256xi32>
    %37 = arith.sitofp %36 : vector<1x256xi32> to vector<1x256xf32>
    %38 = vector.broadcast %35 : vector<8x1xf32> to vector<8x256xf32>
    %39 = vector.broadcast %37 : vector<1x256xf32> to vector<8x256xf32>
    %40 = arith.mulf %38, %39 : vector<8x256xf32>
    %c16_i32_6 = arith.constant 16 : i32
    %41 = vector.broadcast %c16_i32_6 : i32 to vector<1x256xi32>
    %42 = arith.cmpi sge, %13, %41 : vector<1x256xi32>
    %43 = vector.extract_strided_slice %3 {offsets = [0, 1], sizes = [8, 1], strides = [1, 1]} : vector<8x9xf32> to vector<8x1xf32>
    %44 = arith.extui %42 : vector<1x256xi1> to vector<1x256xi32>
    %45 = arith.sitofp %44 : vector<1x256xi32> to vector<1x256xf32>
    %46 = vector.broadcast %43 : vector<8x1xf32> to vector<8x256xf32>
    %47 = vector.broadcast %45 : vector<1x256xf32> to vector<8x256xf32>
    %48 = arith.mulf %46, %47 : vector<8x256xf32>
    %c15_i32 = arith.constant 15 : i32
    %49 = vector.broadcast %c15_i32 : i32 to vector<1x256xi32>
    %50 = arith.cmpi slt, %29, %49 : vector<1x256xi32>
    %c16_i32_7 = arith.constant 16 : i32
    %51 = vector.broadcast %c16_i32_7 : i32 to vector<1x256xi32>
    %52 = arith.cmpi sge, %13, %51 : vector<1x256xi32>
    %53 = arith.andi %50, %52 : vector<1x256xi1>
    %54 = vector.extract_strided_slice %3 {offsets = [0, 2], sizes = [8, 1], strides = [1, 1]} : vector<8x9xf32> to vector<8x1xf32>
    %55 = arith.extui %53 : vector<1x256xi1> to vector<1x256xi32>
    %56 = arith.sitofp %55 : vector<1x256xi32> to vector<1x256xf32>
    %57 = vector.broadcast %54 : vector<8x1xf32> to vector<8x256xf32>
    %58 = vector.broadcast %56 : vector<1x256xf32> to vector<8x256xf32>
    %59 = arith.mulf %57, %58 : vector<8x256xf32>
    %c1_i32_8 = arith.constant 1 : i32
    %60 = vector.broadcast %c1_i32_8 : i32 to vector<1x256xi32>
    %61 = arith.cmpi sge, %29, %60 : vector<1x256xi32>
    %62 = vector.extract_strided_slice %3 {offsets = [0, 3], sizes = [8, 1], strides = [1, 1]} : vector<8x9xf32> to vector<8x1xf32>
    %63 = arith.extui %61 : vector<1x256xi1> to vector<1x256xi32>
    %64 = arith.sitofp %63 : vector<1x256xi32> to vector<1x256xf32>
    %65 = vector.broadcast %62 : vector<8x1xf32> to vector<8x256xf32>
    %66 = vector.broadcast %64 : vector<1x256xf32> to vector<8x256xf32>
    %67 = arith.mulf %65, %66 : vector<8x256xf32>
    %68 = vector.extract_strided_slice %3 {offsets = [0, 4], sizes = [8, 1], strides = [1, 1]} : vector<8x9xf32> to vector<8x1xf32>
    %69 = vector.shape_cast %68 : vector<8x1xf32> to vector<8x1xf32>
    %70 = vector.broadcast %69 : vector<8x1xf32> to vector<8x256xf32>
    %c15_i32_9 = arith.constant 15 : i32
    %71 = vector.broadcast %c15_i32_9 : i32 to vector<1x256xi32>
    %72 = arith.cmpi slt, %29, %71 : vector<1x256xi32>
    %73 = vector.extract_strided_slice %3 {offsets = [0, 5], sizes = [8, 1], strides = [1, 1]} : vector<8x9xf32> to vector<8x1xf32>
    %74 = arith.extui %72 : vector<1x256xi1> to vector<1x256xi32>
    %75 = arith.sitofp %74 : vector<1x256xi32> to vector<1x256xf32>
    %76 = vector.broadcast %73 : vector<8x1xf32> to vector<8x256xf32>
    %77 = vector.broadcast %75 : vector<1x256xf32> to vector<8x256xf32>
    %78 = arith.mulf %76, %77 : vector<8x256xf32>
    %c1_i32_10 = arith.constant 1 : i32
    %79 = vector.broadcast %c1_i32_10 : i32 to vector<1x256xi32>
    %80 = arith.cmpi sge, %29, %79 : vector<1x256xi32>
    %c240_i32 = arith.constant 240 : i32
    %81 = vector.broadcast %c240_i32 : i32 to vector<1x256xi32>
    %82 = arith.cmpi slt, %13, %81 : vector<1x256xi32>
    %83 = arith.andi %80, %82 : vector<1x256xi1>
    %84 = vector.extract_strided_slice %3 {offsets = [0, 6], sizes = [8, 1], strides = [1, 1]} : vector<8x9xf32> to vector<8x1xf32>
    %85 = arith.extui %83 : vector<1x256xi1> to vector<1x256xi32>
    %86 = arith.sitofp %85 : vector<1x256xi32> to vector<1x256xf32>
    %87 = vector.broadcast %84 : vector<8x1xf32> to vector<8x256xf32>
    %88 = vector.broadcast %86 : vector<1x256xf32> to vector<8x256xf32>
    %89 = arith.mulf %87, %88 : vector<8x256xf32>
    %c240_i32_11 = arith.constant 240 : i32
    %90 = vector.broadcast %c240_i32_11 : i32 to vector<1x256xi32>
    %91 = arith.cmpi slt, %13, %90 : vector<1x256xi32>
    %92 = vector.extract_strided_slice %3 {offsets = [0, 7], sizes = [8, 1], strides = [1, 1]} : vector<8x9xf32> to vector<8x1xf32>
    %93 = arith.extui %91 : vector<1x256xi1> to vector<1x256xi32>
    %94 = arith.sitofp %93 : vector<1x256xi32> to vector<1x256xf32>
    %95 = vector.broadcast %92 : vector<8x1xf32> to vector<8x256xf32>
    %96 = vector.broadcast %94 : vector<1x256xf32> to vector<8x256xf32>
    %97 = arith.mulf %95, %96 : vector<8x256xf32>
    %c15_i32_12 = arith.constant 15 : i32
    %98 = vector.broadcast %c15_i32_12 : i32 to vector<1x256xi32>
    %99 = arith.cmpi slt, %29, %98 : vector<1x256xi32>
    %c240_i32_13 = arith.constant 240 : i32
    %100 = vector.broadcast %c240_i32_13 : i32 to vector<1x256xi32>
    %101 = arith.cmpi slt, %13, %100 : vector<1x256xi32>
    %102 = arith.andi %99, %101 : vector<1x256xi1>
    %103 = vector.extract_strided_slice %3 {offsets = [0, 8], sizes = [8, 1], strides = [1, 1]} : vector<8x9xf32> to vector<8x1xf32>
    %104 = arith.extui %102 : vector<1x256xi1> to vector<1x256xi32>
    %105 = arith.sitofp %104 : vector<1x256xi32> to vector<1x256xf32>
    %106 = vector.broadcast %103 : vector<8x1xf32> to vector<8x256xf32>
    %107 = vector.broadcast %105 : vector<1x256xf32> to vector<8x256xf32>
    %108 = arith.mulf %106, %107 : vector<8x256xf32>
    %c0_i32_14 = arith.constant 0 : i32
    %109 = arith.index_cast %c0_i32_14 : i32 to index
    %c0_15 = arith.constant 0 : index
    %c0_16 = arith.constant 0 : index
    %110 = vector.load %arg1[%109, %c0_15, %c0_16] : memref<1x4x256xf32, #tpu.memory_space<vmem>>, vector<1x4x256xf32>
    %111 = vector.shape_cast %110 : vector<1x4x256xf32> to vector<4x256xf32>
    %cst = arith.constant dense<0.000000e+00> : vector<8x256xf32>
    %112 = tpu.matmul %1, %111, %cst {dimension_numbers = #tpu.dot_dimension_numbers<[1], [0], [0], [1], [0, 0, 1, 1], [], []>} : vector<8x4xf32>, vector<4x256xf32>, vector<8x256xf32> -> vector<8x256xf32>
    %113 = arith.addf %112, %8 : vector<8x256xf32>
    %cst_17 = arith.constant 0.000000e+00 : f32
    %114 = vector.broadcast %cst_17 : f32 to vector<8x256xf32>
    %115 = arith.maximumf %113, %114 : vector<8x256xf32>
    %c17_i32 = arith.constant 17 : i32
    %116 = tpu.dynamic_rotate %115 by %c17_i32 dim 1 : vector<8x256xf32>, i32 -> vector<8x256xf32>
    %117 = arith.mulf %40, %116 : vector<8x256xf32>
    %118 = arith.addf %10, %117 : vector<8x256xf32>
    %c16_i32_18 = arith.constant 16 : i32
    %119 = tpu.dynamic_rotate %115 by %c16_i32_18 dim 1 : vector<8x256xf32>, i32 -> vector<8x256xf32>
    %120 = arith.mulf %48, %119 : vector<8x256xf32>
    %121 = arith.addf %118, %120 : vector<8x256xf32>
    %c15_i32_19 = arith.constant 15 : i32
    %122 = tpu.dynamic_rotate %115 by %c15_i32_19 dim 1 : vector<8x256xf32>, i32 -> vector<8x256xf32>
    %123 = arith.mulf %59, %122 : vector<8x256xf32>
    %124 = arith.addf %121, %123 : vector<8x256xf32>
    %c1_i32_20 = arith.constant 1 : i32
    %125 = tpu.dynamic_rotate %115 by %c1_i32_20 dim 1 : vector<8x256xf32>, i32 -> vector<8x256xf32>
    %126 = arith.mulf %67, %125 : vector<8x256xf32>
    %127 = arith.addf %124, %126 : vector<8x256xf32>
    %128 = arith.mulf %70, %115 : vector<8x256xf32>
    %129 = arith.addf %127, %128 : vector<8x256xf32>
    %c255_i32 = arith.constant 255 : i32
    %130 = tpu.dynamic_rotate %115 by %c255_i32 dim 1 : vector<8x256xf32>, i32 -> vector<8x256xf32>
    %131 = arith.mulf %78, %130 : vector<8x256xf32>
    %132 = arith.addf %129, %131 : vector<8x256xf32>
    %c241_i32 = arith.constant 241 : i32
    %133 = tpu.dynamic_rotate %115 by %c241_i32 dim 1 : vector<8x256xf32>, i32 -> vector<8x256xf32>
    %134 = arith.mulf %89, %133 : vector<8x256xf32>
    %135 = arith.addf %132, %134 : vector<8x256xf32>
    %c240_i32_21 = arith.constant 240 : i32
    %136 = tpu.dynamic_rotate %115 by %c240_i32_21 dim 1 : vector<8x256xf32>, i32 -> vector<8x256xf32>
    %137 = arith.mulf %97, %136 : vector<8x256xf32>
    %138 = arith.addf %135, %137 : vector<8x256xf32>
    %c239_i32 = arith.constant 239 : i32
    %139 = tpu.dynamic_rotate %115 by %c239_i32 dim 1 : vector<8x256xf32>, i32 -> vector<8x256xf32>
    %140 = arith.mulf %108, %139 : vector<8x256xf32>
    %141 = arith.addf %138, %140 : vector<8x256xf32>
    %cst_22 = arith.constant 0.000000e+00 : f32
    %142 = vector.broadcast %cst_22 : f32 to vector<8x256xf32>
    %143 = arith.cmpf ogt, %141, %142 : vector<8x256xf32>
    %cst_23 = arith.constant 2.000000e-01 : f32
    %144 = vector.broadcast %cst_23 : f32 to vector<8x256xf32>
    %145 = arith.mulf %144, %141 : vector<8x256xf32>
    %146 = arith.select %143, %141, %145 : vector<8x256xi1>, vector<8x256xf32>
    %cst_24 = arith.constant dense<0.000000e+00> : vector<8x256xf32>
    %147 = tpu.matmul %5, %146, %cst_24 {dimension_numbers = #tpu.dot_dimension_numbers<[1], [0], [0], [1], [0, 0, 1, 1], [], []>} : vector<8x8xf32>, vector<8x256xf32>, vector<8x256xf32> -> vector<8x256xf32>
    %148 = arith.addf %147, %12 : vector<8x256xf32>
    %149 = vector.extract_strided_slice %148 {offsets = [0, 0], sizes = [4, 256], strides = [1, 1]} : vector<8x256xf32> to vector<4x256xf32>
    %150 = math.tanh %149 : vector<4x256xf32>
    %151 = arith.index_cast %c0_i32_14 : i32 to index
    %c0_25 = arith.constant 0 : index
    %c0_26 = arith.constant 0 : index
    %152 = vector.load %arg3[%151, %c0_25, %c0_26] : memref<1x4x256xf32, #tpu.memory_space<vmem>>, vector<1x4x256xf32>
    %153 = vector.shape_cast %152 : vector<1x4x256xf32> to vector<4x256xf32>
    %154 = vector.shape_cast %150 : vector<4x256xf32> to vector<1x4x256xf32>
    tpu.vector_store %arg3[%151, %c0_25, %c0_26], %154 {strides = array<i32>} : memref<1x4x256xf32, #tpu.memory_space<vmem>>, vector<1x4x256xf32>,
    %c1_i32_27 = arith.constant 1 : i32
    return
  }
  func.func @transform_0(%arg0: i32) -> (i32, i32, i32) {
    %c0_i32 = arith.constant 0 : i32
    %c0_i32_0 = arith.constant 0 : i32
    %c0_i32_1 = arith.constant 0 : i32
    return %arg0, %c0_i32, %c0_i32_0 : i32, i32, i32
  }
  func.func @transform_1(%arg0: i32) -> (i32, i32) {
    %c0_i32 = arith.constant 0 : i32
    %c0_i32_0 = arith.constant 0 : i32
    %c0_i32_1 = arith.constant 0 : i32
    return %c0_i32, %c0_i32_0 : i32, i32
  }
  func.func @transform_2(%arg0: i32) -> (i32, i32, i32) {
    %c0_i32 = arith.constant 0 : i32
    %c0_i32_0 = arith.constant 0 : i32
    %c0_i32_1 = arith.constant 0 : i32
    return %arg0, %c0_i32, %c0_i32_0 : i32, i32, i32
  }
}

</mosaic_0001>

<bundles_post_ra>
// kernel: tpu_custom_call.1
= control target key start
LH: loop header
LB: loop body
LE: loop exit
PB: predicated region body
PF: predicated region fallthrough
CT: control target
= control target key end

     0   :  { %7 = vsyncpa [#allocation3], 0  ;;  %s1200_s0 = inlined_call_operand.hbm [shape: f32[2,4,256], index: 0, kind: input, shape index: {}]   ;;  %s1201_s1 = inlined_call_operand.hbm [shape: f32[8,24], index: 1, kind: input, shape index: {}]   ;;  %s1202_s2 = inlined_call_operand.hbm [shape: f32[2,4,256], index: 2, kind: output, shape index: {}]  }
   0x1   :  { %9 = vsyncpa [#allocation3 + $0x1], 0 }
   0x2   :  { %10 = vsyncpa [#allocation6], 0 }
   0x3   :  { %11 = vsyncpa [#allocation4], 0 }
   0x4   :  { %13 = vsyncpa [#allocation4 + $0x1], 0  ;;  %s923_s9 = smov 0   ;;  %s925_s10 = smov 0  }
   0x5   :  { %s927_s11 = smov 0   ;;  %s929_s12 = smov 0  }
   0x6 LB: > { %s944_s13 = sadd.s32 4294967295, %s884_s12   ;;  %s621_s14 = sadd.s32 4294967294, %s884_s12   ;;  %s884_s12 = sphi %s929_s12, %s1220_s12   ;;  %s880_s11 = sphi %s927_s11, %s1219_s11   ;;  %s876_s10 = sphi %s925_s10, %s1218_s10   ;;  %s872_s9 = sphi %s923_s9, %s1217_s9  }
   0x7   : > { %p39_p0 = scmp.ne.s32.totalorder %s876_s10, %s872_s9  ;;  %p40_p1 = scmp.eq.s32.totalorder %s944_s13, 0 }
   0x8   : > { %p84_p2 = scmp.eq.s32.totalorder %s944_s13, 1  ;;  %p90_p3 = scmp.eq.s32.totalorder %s621_s14, 1 }
   0x9   : > { %p953_p4 = por %p40_p1, %p39_p0  ;;  %p622_p5 = scmp.ge.s32.totalorder %s884_s12, 1 }
   0xa   : > { %p958_p6 = por %p90_p3, %p39_p0  ;;  %p97_p7 = scmp.lt.s32.totalorder %s884_s12, 3 }
   0xb   : > { %s109_s19 = sshll.u32 %s1201_s1, 4  ;;  %s886_s21 = smov [#allocation5]   ;;  %s110_s19 = int_to_ptr.hbm [resolvable:$true] %s109_s19 }
   0xc   : > { %p966_p8 = pnand %p622_p5, %p97_p7  ;;  %s111_s22 = sshll.u32 %s886_s21, 4  ;;  %s112_s22 = int_to_ptr.vmem [resolvable:$true] %s111_s22 }
   0xd   : > { %s976_s23 = sadd.s32 1, %s884_s12   ;;  %s26_s24 = sadd.s32 1, %s880_s11 }
   0xe   : > { %p667_p10 = pneg %p966_p8  ;;  %s23_s25 = ssub.s32 %s884_s12, %s976_s23 }
   0xf   : > { %p24_p12 = scmp.eq.s32.totalorder %s23_s25, 0  ;;  %p33_p13 = scmp.ne.s32.totalorder %s880_s11, %s876_s10 }
  0x10   : > { %p668_p11 = pnand %p667_p10, %p40_p1  ;;  %p34_p0 = scmp.eq.s32.totalorder %s884_s12, 0 }
  0x11   : > { %s985_s26 = scalar_select %p24_p12, %s880_s11, %s26_s24  }
  0x12   : > { %670 = dma.hbm_to_vmem [thread:$0]  (!%p668_p11), %s110_s19, 128, %s112_s22, [#allocation6]  }
  0x13   : > { %p989_p3 = por %p84_p2, %p33_p13  ;;  %p680_p5 = scmp.lt.s32.totalorder %s884_s12, 2 }
  0x14   : > { %s122_s28 = sand.u32 1, %s880_s11   ;;  %s657_s29 = sshll.u32 %s884_s12, 3 }
  0x15   : > { %p35_p7 = por %p34_p0, %p33_p13  ;;  %s625_s30 = sshll.u32 %s122_s28, 3 }
  0x16   : > { %s131_s5 = scalar_lea.hbm %s1200_s0, %s657_s29  ;;  %s126_s7 = scalar_lea.vmem [#allocation2], %s625_s30 }
  0x17   : > { %s133_s6 = sshll.u32 %s131_s5, 4  ;;  %s135_s8 = sshll.u32 %s126_s7, 4  ;;  %s134_s6 = int_to_ptr.hbm [resolvable:$true] %s133_s6  ;;  %s136_s8 = int_to_ptr.vmem [resolvable:$true] %s135_s8 }
  0x18   : > { %p999_p10 = pnand %p680_p5, %p35_p7  ;;  %s123_s17 = scalar_lea.sflag [#allocation3], %s122_s28 }
  0x19   : > { %s784_s18 = sshra.s32 %s134_s6, 4  ;;  %s791_s24 = scalar_lea.hbm %s1200_s0, 16  ;;  %s785_s18 = int_to_ptr.hbm [resolvable:$true] %s784_s18 }
  0x1a   : > { %s786_s19 = scalar_lea.hbm %s785_s18, 8  ;;  %p788_p11 = pneg %p999_p10 }
  0x1b   : > { %p787_p2 = scmp.ne.s32.totalorder %s785_s18, %s786_s19  ;;  %p792_p0 = scmp.lt.s32.totalorder %s785_s18, %s1200_s0 }
  0x1c   : > { %p793_p5 = scmp.lt.s32.totalorder %s791_s24, %s786_s19 }
  0x1d   : > { %p789_p12 = pnand %p788_p11, %p787_p2 }
  0x1e   : > { %p794_p7 = por %p793_p5, %p792_p0 }
  0x1f   : > { %p790_p13 = pneg %p789_p12 }
  0x21   : > { %p795_p9 = pnand %p794_p7, %p790_p13 }
  0x23   : > { %798 = shalt.err (!%p795_p9)
}
  0x24   : > { %674 = dma.hbm_to_vmem [thread:$0]  (!%p999_p10), %s134_s6, 128, %s136_s8, %s123_s17  }
  0x25   : > { %144 = sbr.rel (%p966_p8) target bundleno = 505 (0x1f9), region = 28  ;;  %s1016_s28 = sand.u32 (!%p966_p8), 1, %s876_s10  }
  0x26   : > { %s629_s30 = sshll.u32 (!%p966_p8), %s1016_s28, 3  ;;  %s147_s3 = scalar_lea.sflag (!%p966_p8), [#allocation3], %s1016_s28 }
  0x27   : > { %s150_s4 = scalar_lea.vmem (!%p966_p8), [#allocation2], %s629_s30 }
  0x2a   : > { %859 = dma.done.wait (%p953_p4), %s147_s3, 128  }
  0x2b   : > { %861 = vsyncadd (%p953_p4), %s147_s3, 4294967168 }
  0x2c   : > { %863 = dma.done.wait (%p40_p1), [#allocation6], 128  }
  0x2d   : > { %865 = vsyncadd (%p40_p1), [#allocation6], 4294967168  ;;  %v887_v0 = vmov 14   ;;  %v888_v1 = vmov 4   ;;  %v889_v2 = vmov 6   ;;  %v318_v3 = vld [vmem:[%s150_s4] sm:$0xff]  ;;  %v191_v32 = vlaneseq }
  0x2e   : > { %739 = vset.pattern.permute.xlu1 %v887_v0  ;;  %737 = vset.pattern.permute.xlu0 %v888_v1  ;;  %v1030_v4 = vld [vmem:[#allocation5] sm:$0xff]  ;;  %320 = vst [vmem:[#allocation1] ss:$2 sm:$0xff] %v318_v3  ;;  %vm326_vm0 = vcmask 1043456   ;;  %vm323_vm1 = vcmask 31744   ;;  %v890_v7 = vmov 8  }
  0x2f   : > { %740 = vset.pattern.permute.xlu2 %v889_v2  ;;  %184 = vperm.xlu1 %739, %v1030_v4   ;;  %v891_v8 = vmov 10   ;;  %v892_v9 = vmov 5   ;;  %v893_v10 = vmov 9   ;;  %v894_v11 = vmov 11   ;;  %s896_s15 = smov 1   ;;  %s897_s20 = smov 16  }
  0x30   : > { %180 = vperm.xlu0 %737, %v1030_v4   ;;  %239 = vperm.xlu2 %740, %v1030_v4   ;;  %v895_v12 = vmov 7   ;;  %s898_s5 = smov 17   ;;  %s899_s6 = smov 127   ;;  %v902_v20 = vmov 12   ;;  %v905_v21 = vmov 13   ;;  %v1077_v34 = vand.u32 127, %v191_v32 }
  0x31   : > { %s900_s7 = smov 113   ;;  %s901_s8 = smov 15   ;;  %v906_v45 = vmov 0.0   ;;  %v907_v60 = vmov 23  }
  0x32   : > { %s903_s14 = smov 112   ;;  %s904_s17 = smov 111   ;;  %v1080_v37 = vadd.s32 128, %v1077_v34  ;;  %v198_v38 = vand.u32 15, %v1077_v34  ;;  %vm220_vm3 = vcmp.ge.s32.totalorder %v1077_v34, 16  ;;  %vm377_vm6 = vcmp.lt.s32.totalorder %v1077_v34, 17 }
  0x33   : > { %v634_v55 = vsel %vm220_vm3, 1.0, %v906_v45  ;;  %vm388_vm10 = vcmp.lt.s32.totalorder %v1077_v34, 16  ;;  %vm399_vm11 = vcmp.lt.s32.totalorder %v1077_v34, 15  ;;  %vm410_vm13 = vcmp.lt.s32.totalorder %v1077_v34, 1  ;;  %s658_s18 = sshll.u32 %s944_s13, 3  ;;  %s176_s24 = scalar_lea.vmem [#allocation7], %s629_s30 }
  0x34   : > { %v205_v40 = vand.u32 15, %v1080_v37  ;;  %vm1084_vm2 = vcmp.ge.s32.totalorder %v198_v38, 1  ;;  %vm1104_vm7 = vcmp.lt.s32.totalorder %v198_v38, 15  ;;  %vm283_vm12 = vcmp.lt.s32.totalorder %v1080_v37, 240  ;;  %s536_s22 = scalar_lea.hbm %s1202_s2, %s658_s18  ;;  %s538_s25 = sshll.u32 %s176_s24, 4  ;;  %s539_s25 = int_to_ptr.vmem [resolvable:$true] %s538_s25 }
  0x35   : > { %v321_v5 = vld.sshfl [vmem:[#allocation1] sm:$0xff pattern:$0x75316420]  ;;  %v322_v6 = vld.sshfl [vmem:[#allocation1 + $0x8] sm:$0xff pattern:$0x75316420]  ;;  %vm222_vm4 = vmand %vm1084_vm2, %vm220_vm3 }
  0x36   : > { %646 = vmatpush.msk.msra.mxu0 %vm326_vm0, %v321_v5  ;;  %648 = vmatpush.msk.msra.mxu1 %vm326_vm0, %v322_v6  ;;  %vm1095_vm5 = vcmp.ge.s32.totalorder %v205_v40, 1  ;;  %v632_v46 = vsel %vm222_vm4, 1.0, %v906_v45  ;;  %vm246_vm8 = vmand %vm1104_vm7, %vm220_vm3  ;;  %vm1115_vm9 = vcmp.lt.s32.totalorder %v205_v40, 15  ;;  %vm425_vm15 = vcmp.lt.s32.totalorder %v1077_v34, 127  ;;  %s540_s29 = sshll.u32 %s536_s22, 4  ;;  %s525_s13 = scalar_lea.sflag [#allocation4], %s1016_s28  ;;  %s541_s29 = int_to_ptr.hbm [resolvable:$true] %s540_s29 }
  0x37   : > { %647 = vmatmul.msk.f32.vlgmr.msra.gmra.mxu0 %vm323_vm1, %v1030_v4  ;;  %649 = vmatmul.msk.f32.vlgmr.msra.gmra.mxu1 %vm323_vm1, %v1030_v4  ;;  %v633_v47 = vsel %vm1095_vm5, 1.0, %v906_v45  ;;  %v635_v59 = vsel %vm246_vm8, 1.0, %v906_v45  ;;  %v636_v62 = vsel %vm1115_vm9, 1.0, %v906_v45  ;;  %vm285_vm14 = vmand %vm1095_vm5, %vm283_vm12  ;;  %vm436_vm1 = vcmp.lt.s32.totalorder %v1077_v34, 113  ;;  %s828_s3 = sshra.s32 %s541_s29, 4  ;;  %s829_s3 = int_to_ptr.hbm [resolvable:$true] %s828_s3 }
  0x38   : > { %742 = vset.pattern.permute.xlu1 %v890_v7  ;;  %744 = vset.pattern.permute.xlu2 %v891_v8  ;;  %v642_v32 = vsel %vm285_vm14, 1.0, %v906_v45  ;;  %vm447_vm3 = vcmp.lt.s32.totalorder %v1077_v34, 112  ;;  %vm458_vm4 = vcmp.lt.s32.totalorder %v1077_v34, 111  ;;  %s830_s4 = scalar_lea.hbm %s829_s3, 8  ;;  %p835_p9 = scmp.lt.s32.totalorder %s829_s3, %s1202_s2 }
  0x39   : > { %263 = vperm.xlu1 %742, %v1030_v4   ;;  %738 = vset.pattern.permute.xlu0 %v892_v9  ;;  %v637_v9 = vsel %vm1084_vm2, 1.0, %v906_v45  ;;  %vm307_vm2 = vmand %vm1115_vm9, %vm283_vm12  ;;  %p831_p1 = scmp.ne.s32.totalorder %s829_s3, %s830_s4 }
  0x3a   : > { %277 = vperm.xlu2 %744, %v1030_v4   ;;  %229 = vperm.xlu0 %738, %v1030_v4   ;;  %v645_v37 = vsel %vm307_vm2, 1.0, %v906_v45 }
  0x3b   : > { %p832_p4 = pnand %p831_p1, %p989_p3 }
  0x3d   : > { %p833_p8 = pneg %p832_p4 }
  0x41   : > { %743 = vset.pattern.permute.xlu1 %v893_v10 }
  0x42   : > { %269 = vperm.xlu1 %743, %v1030_v4   ;;  %745 = vset.pattern.permute.xlu2 %v894_v11 }
  0x43   : > { %291 = vperm.xlu2 %745, %v1030_v4   ;;  %741 = vset.pattern.permute.xlu0 %v895_v12 }
  0x44   : > { %253 = vperm.xlu0 %741, %v1030_v4  }
  0x4b   : > { %746 = vset.pattern.permute.xlu2 %v902_v20 }
  0x4c   : > { %748 = vset.pattern.permute.xlu0 %v907_v60 }
  0x8a   : > { %v240_v22 = vpop.permute.xlu2 %239 }
  0x8b   : > { %v242_v61 = vmul.f32 %v634_v55, %v240_v22 }
  0x94   : > { %v1069_v24 = vpop.permute.xlu2 %277 }
  0x9d   : > { %v1073_v26 = vpop.permute.xlu2 %291 }
  0x9e   : > { %v294_v42 = vmul.f32 %v637_v9, %v1073_v26 }
  0xa1   : > { %v185_v23 = vpop.permute.xlu1 %184 }
  0xa2   : > { %v181_v13 = vpop.permute.xlu0 %180 }
  0xab   : > { %v1071_v25 = vpop.permute.xlu1 %263 }
  0xac   : > { %v230_v27 = vpop.permute.xlu0 %229  ;;  %v267_v20 = vmul.f32 %v633_v47, %v1071_v25 }
  0xad   : > { %v232_v51 = vmul.f32 %v632_v46, %v230_v27  ;;  %v233_v52 = vmul.f32 %v633_v47, %v230_v27 }
  0xb4   : > { %v348_v14 = vpop.f32.mrf.mxu0  ;;  %v368_v15 = vpop.f32.mrf.mxu1 }
  0xb5   : > { %v349_v16 = vadd.f32 %v348_v14, %v181_v13  ;;  %v369_v17 = vadd.f32 %v368_v15, %v181_v13  ;;  %v1075_v28 = vpop.permute.xlu1 %269 }
  0xb6   : > { %v254_v30 = vpop.permute.xlu0 %253 }
  0xb7   : > { %v1045_v18 = vmax.f32 %v349_v16, 0.0  ;;  %v1047_v19 = vmax.f32 %v369_v17, 0.0  ;;  %v256_v5 = vmul.f32 %v635_v59, %v254_v30  ;;  %v257_v6 = vmul.f32 %v636_v62, %v254_v30 }
  0xb8   : > { %v266_v17 = vmul.f32 %v637_v9, %v1071_v25 }
  0xb9   : > { %408 = vrot.lane.b32.xlu0 %v1047_v19, %s896_s15  ;;  %384 = vrot.lane.b32.xlu2 %v1045_v18, %s897_s20  ;;  %v417_v25 = vmul.f32 %v1045_v18, %v1075_v28 }
  0xba   : > { %373 = vrot.lane.b32.xlu1 %v1045_v18, %s898_s5 }
  0xc1   : > { %421 = vrot.lane.b32.xlu0 %v1045_v18, %s899_s6  ;;  %386 = vrot.lane.b32.xlu2 %v1047_v19, %s897_s20  ;;  %s834_s20 = scalar_lea.hbm %s1202_s2, 16 }
  0xc2   : > { %375 = vrot.lane.b32.xlu1 %v1047_v19, %s898_s5  ;;  %p836_p10 = scmp.lt.s32.totalorder %s834_s20, %s830_s4 }
  0xc4   : > { %p837_p2 = por %p836_p10, %p835_p9 }
  0xc6   : > { %p838_p11 = pnand %p837_p2, %p833_p8 }
  0xc9   : > { %432 = vrot.lane.b32.xlu0 %v1045_v18, %s900_s7  ;;  %397 = vrot.lane.b32.xlu2 %v1047_v19, %s901_s8 }
  0xca   : > { %395 = vrot.lane.b32.xlu1 %v1045_v18, %s901_s8 }
  0xd1   : > { %443 = vrot.lane.b32.xlu0 %v1045_v18, %s903_s14  ;;  %406 = vrot.lane.b32.xlu2 %v1045_v18, %s896_s15 }
  0xd2   : > { %423 = vrot.lane.b32.xlu1 %v1047_v19, %s899_s6 }
  0xd9   : > { %454 = vrot.lane.b32.xlu0 %v1045_v18, %s904_s17  ;;  %301 = vperm.xlu2 %746, %v1030_v4   ;;  %v643_v18 = vsel %vm283_vm12, 1.0, %v906_v45 }
  0xda   : > { %434 = vrot.lane.b32.xlu1 %v1047_v19, %s900_s7 }
  0xe1   : > { %747 = vset.pattern.permute.xlu2 %v905_v21  ;;  %188 = vperm.xlu0 %748, %v1030_v4  }
  0xe2   : > { %445 = vrot.lane.b32.xlu1 %v1047_v19, %s903_s14  ;;  %313 = vperm.xlu2 %747, %v1030_v4  }
  0xe9   : > { %749 = vset.pattern.permute.xlu0 %v905_v21 }
  0xea   : > { %456 = vrot.lane.b32.xlu1 %v1047_v19, %s904_s17  ;;  %471 = vrot.lane.b32.xlu2 %v1030_v4, %s900_s7 }
 0x113   : > { %v385_v29 = vpop.permute.xlu2 %384 }
 0x11b   : > { %v387_v33 = vpop.permute.xlu2 %386 }
 0x11c   : > { %v389_v0 = vsel %vm388_vm10, %v385_v29, %v387_v33  ;;  %v390_v1 = vsel %vm388_vm10, %v387_v33, %v385_v29 }
 0x11d   : > { %v391_v10 = vmul.f32 %v390_v1, %v242_v61  ;;  %v392_v11 = vmul.f32 %v389_v0, %v240_v22  ;;  %v639_v22 = vsel %vm1104_vm7, 1.0, %v906_v45  ;;  %vm473_vm7 = vcmask 64512  }
 0x11e   : > { %v280_v38 = vmul.f32 %v639_v22, %v1069_v24 }
 0x123   : > { %v398_v39 = vpop.permute.xlu2 %397 }
 0x12b   : > { %v409_v35 = vpop.permute.xlu0 %408  ;;  %v407_v53 = vpop.permute.xlu2 %406 }
 0x12c   : > { %v374_v31 = vpop.permute.xlu1 %373  ;;  %v412_v27 = vsel %vm410_vm13, %v409_v35, %v407_v53 }
 0x12d   : > { %v413_v33 = vmul.f32 %v412_v27, %v266_v17 }
 0x133   : > { %v1093_v43 = vpop.permute.xlu0 %421  ;;  %v302_v14 = vpop.permute.xlu2 %301 }
 0x134   : > { %v376_v36 = vpop.permute.xlu1 %375 }
 0x135   : > { %v378_v49 = vsel %vm377_vm6, %v374_v31, %v376_v36  ;;  %v379_v50 = vsel %vm377_vm6, %v376_v36, %v374_v31  ;;  %v418_v31 = vmul.f32 %v1047_v19, %v1075_v28  ;;  %v281_v19 = vmul.f32 %v636_v62, %v1069_v24 }
 0x136   : > { %v380_v57 = vmul.f32 %v379_v50, %v232_v51  ;;  %v381_v58 = vmul.f32 %v378_v49, %v233_v52  ;;  %v305_v49 = vmul.f32 %v643_v18, %v302_v14 }
 0x138   : > { %v382_v7 = vadd.f32 %v380_v57, %v185_v23  ;;  %v383_v8 = vadd.f32 %v381_v58, %v185_v23  ;;  %v411_v23 = vsel %vm410_vm13, %v407_v53, %v409_v35 }
 0x139   : > { %v414_v35 = vmul.f32 %v411_v23, %v267_v20 }
 0x13a   : > { %v393_v15 = vadd.f32 %v391_v10, %v382_v7  ;;  %v394_v16 = vadd.f32 %v392_v11, %v383_v8 }
 0x13b   : > { %v433_v63 = vpop.permute.xlu0 %432 }
 0x13c   : > { %v396_v41 = vpop.permute.xlu1 %395  ;;  %v314_v50 = vpop.permute.xlu2 %313 }
 0x13d   : > { %v400_v2 = vsel %vm399_vm11, %v396_v41, %v398_v39  ;;  %v401_v3 = vsel %vm399_vm11, %v398_v39, %v396_v41  ;;  %v316_v56 = vmul.f32 %v639_v22, %v314_v50  ;;  %v317_v57 = vmul.f32 %v645_v37, %v314_v50 }
 0x13e   : > { %v402_v12 = vmul.f32 %v401_v3, %v256_v5  ;;  %v403_v4 = vmul.f32 %v400_v2, %v257_v6 }
 0x140   : > { %v404_v29 = vadd.f32 %v402_v12, %v393_v15  ;;  %v405_v30 = vadd.f32 %v403_v4, %v394_v16 }
 0x142   : > { %v415_v21 = vadd.f32 %v413_v33, %v404_v29  ;;  %v416_v28 = vadd.f32 %v414_v35, %v405_v30 }
 0x143   : > { %v444_v36 = vpop.permute.xlu0 %443 }
 0x144   : > { %v424_v54 = vpop.permute.xlu1 %423  ;;  %v420_v24 = vadd.f32 %v418_v31, %v416_v28  ;;  %v419_v53 = vadd.f32 %v417_v25, %v415_v21  ;;  %v472_v10 = vpop.permute.xlu2 %471 }
 0x145   : > { %v426_v39 = vsel %vm425_vm15, %v1093_v43, %v424_v54  ;;  %v427_v40 = vsel %vm425_vm15, %v424_v54, %v1093_v43  ;;  %v295_v43 = vmul.f32 %v642_v32, %v1073_v26 }
 0x146   : > { %v428_v47 = vmul.f32 %v426_v39, %v280_v38  ;;  %v429_v48 = vmul.f32 %v427_v40, %v281_v19 }
 0x148   : > { %v430_v58 = vadd.f32 %v428_v47, %v419_v53  ;;  %v431_v26 = vadd.f32 %v429_v48, %v420_v24 }
 0x14b   : > { %v455_v61 = vpop.permute.xlu0 %454 }
 0x14c   : > { %v435_v13 = vpop.permute.xlu1 %434 }
 0x14d   : > { %v437_v44 = vsel %vm436_vm1, %v433_v63, %v435_v13  ;;  %v438_v46 = vsel %vm436_vm1, %v435_v13, %v433_v63 }
 0x14e   : > { %v439_v54 = vmul.f32 %v437_v44, %v294_v42  ;;  %v440_v55 = vmul.f32 %v438_v46, %v295_v43 }
 0x150   : > { %v441_v62 = vadd.f32 %v439_v54, %v430_v58  ;;  %v442_v63 = vadd.f32 %v440_v55, %v431_v26 }
 0x153   : > { %v189_v4 = vpop.permute.xlu0 %188 }
 0x154   : > { %v446_v41 = vpop.permute.xlu1 %445 }
 0x155   : > { %v448_v51 = vsel %vm447_vm3, %v444_v36, %v446_v41  ;;  %v449_v52 = vsel %vm447_vm3, %v446_v41, %v444_v36 }
 0x156   : > { %v450_v59 = vmul.f32 %v448_v51, %v302_v14  ;;  %v451_v60 = vmul.f32 %v449_v52, %v305_v49 }
 0x158   : > { %v452_v2 = vadd.f32 %v450_v59, %v441_v62  ;;  %v453_v3 = vadd.f32 %v451_v60, %v442_v63 }
 0x15c   : > { %v457_v0 = vpop.permute.xlu1 %456 }
 0x15d   : > { %v459_v45 = vsel %vm458_vm4, %v455_v61, %v457_v0  ;;  %v460_v1 = vsel %vm458_vm4, %v457_v0, %v455_v61 }
 0x15e   : > { %v461_v5 = vmul.f32 %v459_v45, %v316_v56  ;;  %v462_v6 = vmul.f32 %v460_v1, %v317_v57 }
 0x160   : > { %v463_v7 = vadd.f32 %v461_v5, %v452_v2  ;;  %v464_v8 = vadd.f32 %v462_v6, %v453_v3 }
 0x162   : > { %vm465_vm5 = vcmp.gt.f32.partialorder %v463_v7, 0.0  ;;  %v467_v9 = vmul.f32 0.2, %v463_v7  ;;  %vm466_vm6 = vcmp.gt.f32.partialorder %v464_v8, 0.0  ;;  %v468_v34 = vmul.f32 0.2, %v464_v8 }
 0x164   : > { %v469_v11 = vsel %vm465_vm5, %v463_v7, %v467_v9  ;;  %v470_v12 = vsel %vm466_vm6, %v464_v8, %v468_v34 }
 0x165   : > { %491 = vmatpush.msra.mxu2 %v469_v11  ;;  %511 = vmatpush.msra.mxu3 %v470_v12 }
 0x166   : > { %650 = vmatmul.msk.f32.vlgmr.msra.gmra.mxu2 %vm473_vm7, %v472_v10  ;;  %651 = vmatmul.msk.f32.vlgmr.msra.gmra.mxu3 %vm473_vm7, %v472_v10 }
 0x1e9   : > { %v493_v13 = vpop.f32.mrf.mxu2  ;;  %v513_v14 = vpop.f32.mrf.mxu3 }
 0x1ea   : > { %v514_v15 = vadd.f32 %v513_v14, %v189_v4  ;;  %v494_v16 = vadd.f32 %v493_v13, %v189_v4 }
 0x1ec   : > { %750 = vtanh.f32 %v514_v15 }
 0x1ed   : > { %752 = vtanh.f32 %v494_v16 }
 0x1f2   : > { %v751_v17 = vpop.eup %750 }
 0x1f3   : > { %v520_v20 = vrot.slane %v751_v17, 4  ;;  %v753_v23 = vpop.eup %752 }
 0x1f5   : > { %v521_v27 = vsel %vm326_vm0, %v753_v23, %v520_v20 }
 0x1f6   : > { %523 = vst [vmem:[%s176_s24] sm:$0xff] %v521_v27 }
 0x1f7   : > { %841 = shalt.err (!%p838_p11)
}
 0x1f8   : > { %665 = dma.vmem_to_hbm [thread:$0]  (%p989_p3), %s539_s25, 128, %s541_s29, %s525_s13  }
 0x1f9 PF: > { %s552_s28 = sand.u32 1, %s872_s9   ;;  %p1216_p12 = scmp.ge.s32.totalorder %s884_s12, 2 }
 0x1fa   : > { %s553_s7 = scalar_lea.sflag [#allocation4], %s552_s28 }
 0x1fb   : > { %p676_p13 = pnand %p1216_p12, %p958_p6 }
 0x1fd   : > { %p677_p0 = pneg %p676_p13 }
 0x1ff   : > { %867 = dma.done.wait (%p677_p0), %s553_s7, 128  }
 0x200   : > { %869 = vsyncadd (%p677_p0), %s553_s7, 4294967168  ;;  %p16_p5 = scmp.ge.s32.totalorder %s976_s23, 4   ;;  %s1217_s9 = smov %s876_s10 }
 0x201   : > { %s1218_s10 = smov %s880_s11  ;;  %s1219_s11 = smov %s985_s26 }
 0x202   : > { %s1220_s12 = smov %s976_s23  ;;  %18 = sbr.rel (!%p16_p5) target bundleno = 6 (0x6), region = 77 }
 0x207   :  { %559 = vsyncpa [#allocation3], 1 }
 0x208   :  { %561 = vsyncpa [#allocation3 + $0x1], 1 }
 0x209   :  { %562 = vsyncpa [#allocation6], 1 }
 0x20a   :  { %563 = vsyncpa [#allocation4], 1 }
 0x20b   :  { %565 = vsyncpa [#allocation4 + $0x1], 1 }

</bundles_post_ra>
